<compile_context>
chip_gen: v5e
topology: v5e:2x2
jax: 0.10.0
libtpu: 0.0.40
codegen_flags: <defaults>
</compile_context>

<pallas_src>
import jax
import jax.numpy as jnp
from jax.experimental import pallas as pl
from jax.experimental.pallas import tpu as pltpu


def gru_recurrence_kernel(gi_ref, whcat_ref, bhn_ref, h_out_ref):
    S, B, _ = gi_ref.shape
    H = whcat_ref.shape[0]

    whcat = whcat_ref[...]          # (H, 3H) recurrent weights, gate order [r | z | n]
    bhn = bhn_ref[...]              # (1, H)  b_hn (kept separate: PyTorch scales it by r)

    h = jnp.zeros((B, H), jnp.float32)
    # Fully unrolled serial recurrence (S is small); ONE fused MXU matmul per step.
    for t in range(S):
        gi = gi_ref[t]              # (B, 3H): pre-projected W_i* x_t (+ folded biases); per-step VMEM read
        gh = jnp.dot(h, whcat, preferred_element_type=jnp.float32)   # (B, 3H)
        r = jax.nn.sigmoid(gi[:, :H] + gh[:, :H])
        z = jax.nn.sigmoid(gi[:, H:2 * H] + gh[:, H:2 * H])
        n = jnp.tanh(gi[:, 2 * H:] + r * (gh[:, 2 * H:] + bhn))
        h = (1.0 - z) * n + z * h
    # TODO(synk): holding whcat in MXU weight regs across steps via explicit
    # matmul_push_rhs/matmul_acc_lhs/matmul_pop could shave the per-step RHS reload.
    h_out_ref[...] = h.astype(h_out_ref.dtype)


def pack_gru_params(emb_table, w_ih, w_hh, b_ih, b_hh):
    """One-time (init) packing. Pre-projects the embedding table through the input weights.

    gi(token) = emb[token] @ w_ih.T + b_ih, with b_hr/b_hz folded in (b_hn stays on the
    h-projection because PyTorch computes n = tanh(i_n + b_in + r * (W_hn h + b_hn))).
    """
    H = w_hh.shape[1]
    b_fold = jnp.concatenate([b_ih[:2 * H] + b_hh[:2 * H], b_ih[2 * H:]])            # (3H,)
    table = emb_table.astype(jnp.float32) @ jnp.transpose(w_ih) + b_fold[None, :]    # (VOCAB, 3H)
    w_hcat = jnp.transpose(w_hh)                                                     # (H, 3H), [r|z|n]
    b_hn = b_hh[2 * H:].reshape(1, H)                                                # (1, H)
    return table, w_hcat, b_hn


def gru_encoder(gi, w_hcat, b_hn):
    """gi: (S, B, 3H) f32 pre-projected inputs; w_hcat: (H, 3H); b_hn: (1, H). Returns (B, H)."""
    S, B, H3 = gi.shape
    H = w_hcat.shape[0]

    full = lambda shape: pl.BlockSpec(shape, lambda i: (0,) * len(shape))

    return pl.pallas_call(
        gru_recurrence_kernel,
        out_shape=jax.ShapeDtypeStruct((B, H), jnp.float32),
        grid_spec=pltpu.PrefetchScalarGridSpec(
            num_scalar_prefetch=0,
            grid=(1,),  # single invocation: whole problem (<50 KiB) is VMEM-resident
            in_specs=[full((S, B, H3)), full((H, H3)), full((1, H))],
            out_specs=full((B, H)),
        ),
        compiler_params=pltpu.CompilerParams(
            dimension_semantics=("arbitrary",),
        ),
    )(gi, w_hcat, b_hn)


def encoder_forward(tokens, table, w_hcat, b_hn):
    """tokens: (S, B) int32; packed params from pack_gru_params(). Returns h_n (1, B, H)."""
    S, B = tokens.shape
    H = w_hcat.shape[0]
    if S == 0:  # empty sequence: h_n = h0 = zeros (guarded here, not with a 0-size block)
        return jnp.zeros((1, B, H), jnp.float32)

    # Dropout p=0.0 -> identity, so the embedding + input-projection fold is exact.
    # TODO(synk): training-mode dropout (p>0) would need to be applied to the raw embedding
    #             before the input projection; not implemented (eval / p=0 semantics).
    # TODO(synk): the row gather could be fused in-kernel via scalar-prefetched token ids;
    #             kept as a single XLA gather for lowering robustness.
    gi = jnp.take(table, tokens.reshape(-1), axis=0).reshape(S, B, 3 * H)
    h_last = gru_encoder(gi, w_hcat, b_hn)
    # (num_layers * num_directions, B, H) = (1, B, H), matching PyTorch GRU h_n.
    return h_last[None]


def _reference(tokens, emb_table, w_ih, w_hh, b_ih, b_hh):
    # Pure-JAX reference GRU (PyTorch gate order / equations), from raw parameters.
    x_emb = jnp.take(emb_table, tokens, axis=0).astype(jnp.float32)
    H = w_hh.shape[1]
    B = tokens.shape[1]

    def step(h, x_t):
        gi = x_t @ w_ih.T + b_ih
        gh = h @ w_hh.T + b_hh
        i_r, i_z, i_n = gi[:, :H], gi[:, H:2 * H], gi[:, 2 * H:]
        h_r, h_z, h_n = gh[:, :H], gh[:, H:2 * H], gh[:, 2 * H:]
        r = jax.nn.sigmoid(i_r + h_r)
        z = jax.nn.sigmoid(i_z + h_z)
        n = jnp.tanh(i_n + r * h_n)
        h_new = (1.0 - z) * n + z * h
        return h_new, None

    h0 = jnp.zeros((B, H), jnp.float32)
    h_fin, _ = jax.lax.scan(step, h0, x_emb)
    return h_fin[None]


if __name__ == "__main__":
    VOCAB, EMB, HID = 50, 32, 32
    SEQ, BATCH = 8, 4

    key = jax.random.PRNGKey(0)
    k_emb, k_wih, k_whh, k_bih, k_bhh, k_tok = jax.random.split(key, 6)

    emb_table = jax.random.normal(k_emb, (VOCAB, EMB), jnp.float32) * 0.1
    w_ih = jax.random.normal(k_wih, (3 * HID, EMB), jnp.float32) * 0.1
    w_hh = jax.random.normal(k_whh, (3 * HID, HID), jnp.float32) * 0.1
    b_ih = jax.random.normal(k_bih, (3 * HID,), jnp.float32) * 0.1
    b_hh = jax.random.normal(k_bhh, (3 * HID,), jnp.float32) * 0.1

    tokens = jax.random.randint(k_tok, (SEQ, BATCH), 0, VOCAB, jnp.int32)

    # One-time weight packing (init-time; not part of the per-call path).
    table, w_hcat, b_hn = pack_gru_params(emb_table, w_ih, w_hh, b_ih, b_hh)
    table, w_hcat, b_hn = jax.block_until_ready((table, w_hcat, b_hn))

    hiddens = encoder_forward(tokens, table, w_hcat, b_hn)
    hiddens = jax.block_until_ready(hiddens)

    ref = _reference(tokens, emb_table, w_ih, w_hh, b_ih, b_hh)
    assert hiddens.shape == (1, BATCH, HID)
    assert jnp.allclose(hiddens, ref, atol=1e-5, rtol=1e-5)

    print("KERNEL_OK")
</pallas_src>

<mosaic_0001>
module attributes {stable_mosaic.version = 11 : i64} {
  func.func @gru_recurrence_kernel(%arg0: i32, %arg1: memref<8x4x96xf32, #tpu.memory_space<vmem>>, %arg2: memref<32x96xf32, #tpu.memory_space<vmem>>, %arg3: memref<1x32xf32, #tpu.memory_space<vmem>>, %arg4: memref<4x32xf32, #tpu.memory_space<vmem>>) attributes {dimension_semantics = [#tpu.dimension_semantics<arbitrary>], iteration_bounds = array<i64: 1>, scalar_prefetch = 0 : i64, scratch_operands = 0 : i64, tpu.core_type = #tpu.core_type<tc>, window_params = [{pipeline_mode = #tpu.pipeline_mode<synchronous>, transform_indices = @transform_0, window_bounds = array<i64: 8, 4, 96>}, {pipeline_mode = #tpu.pipeline_mode<synchronous>, transform_indices = @transform_1, window_bounds = array<i64: 32, 96>}, {pipeline_mode = #tpu.pipeline_mode<synchronous>, transform_indices = @transform_2, window_bounds = array<i64: 1, 32>}, {pipeline_mode = #tpu.pipeline_mode<synchronous>, transform_indices = @transform_3, window_bounds = array<i64: 4, 32>}]} {
    %c0 = arith.constant 0 : index
    %c0_0 = arith.constant 0 : index
    %0 = vector.load %arg2[%c0, %c0_0] : memref<32x96xf32, #tpu.memory_space<vmem>>, vector<32x96xf32>
    %c0_1 = arith.constant 0 : index
    %c0_2 = arith.constant 0 : index
    %1 = vector.load %arg3[%c0_1, %c0_2] : memref<1x32xf32, #tpu.memory_space<vmem>>, vector<1x32xf32>
    %cst = arith.constant 0.000000e+00 : f32
    %2 = vector.broadcast %cst : f32 to vector<4x32xf32>
    %c0_3 = arith.constant 0 : index
    %c0_4 = arith.constant 0 : index
    %c0_5 = arith.constant 0 : index
    %3 = vector.load %arg1[%c0_3, %c0_4, %c0_5] : memref<8x4x96xf32, #tpu.memory_space<vmem>>, vector<1x4x96xf32>
    %4 = vector.shape_cast %3 : vector<1x4x96xf32> to vector<4x96xf32>
    %cst_6 = arith.constant dense<0.000000e+00> : vector<4x96xf32>
    %5 = tpu.matmul %2, %0, %cst_6 {dimension_numbers = #tpu.dot_dimension_numbers<[1], [0], [0], [1], [0, 0, 1, 1], [], []>} : vector<4x32xf32>, vector<32x96xf32>, vector<4x96xf32> -> vector<4x96xf32>
    %6 = vector.extract_strided_slice %4 {offsets = [0, 0], sizes = [4, 32], strides = [1, 1]} : vector<4x96xf32> to vector<4x32xf32>
    %7 = vector.extract_strided_slice %5 {offsets = [0, 0], sizes = [4, 32], strides = [1, 1]} : vector<4x96xf32> to vector<4x32xf32>
    %8 = arith.addf %6, %7 : vector<4x32xf32>
    %9 = arith.negf %8 : vector<4x32xf32>
    %10 = math.exp %9 : vector<4x32xf32>
    %cst_7 = arith.constant 1.000000e+00 : f32
    %11 = vector.broadcast %cst_7 : f32 to vector<4x32xf32>
    %12 = arith.addf %11, %10 : vector<4x32xf32>
    %13 = arith.divf %11, %12 : vector<4x32xf32>
    %14 = vector.extract_strided_slice %4 {offsets = [0, 32], sizes = [4, 32], strides = [1, 1]} : vector<4x96xf32> to vector<4x32xf32>
    %15 = vector.extract_strided_slice %5 {offsets = [0, 32], sizes = [4, 32], strides = [1, 1]} : vector<4x96xf32> to vector<4x32xf32>
    %16 = arith.addf %14, %15 : vector<4x32xf32>
    %17 = arith.negf %16 : vector<4x32xf32>
    %18 = math.exp %17 : vector<4x32xf32>
    %cst_8 = arith.constant 1.000000e+00 : f32
    %19 = vector.broadcast %cst_8 : f32 to vector<4x32xf32>
    %20 = arith.addf %19, %18 : vector<4x32xf32>
    %21 = arith.divf %19, %20 : vector<4x32xf32>
    %22 = vector.extract_strided_slice %4 {offsets = [0, 64], sizes = [4, 32], strides = [1, 1]} : vector<4x96xf32> to vector<4x32xf32>
    %23 = vector.extract_strided_slice %5 {offsets = [0, 64], sizes = [4, 32], strides = [1, 1]} : vector<4x96xf32> to vector<4x32xf32>
    %24 = vector.broadcast %1 : vector<1x32xf32> to vector<4x32xf32>
    %25 = arith.addf %23, %24 : vector<4x32xf32>
    %26 = arith.mulf %13, %25 : vector<4x32xf32>
    %27 = arith.addf %22, %26 : vector<4x32xf32>
    %28 = math.tanh %27 : vector<4x32xf32>
    %cst_9 = arith.constant 1.000000e+00 : f32
    %29 = vector.broadcast %cst_9 : f32 to vector<4x32xf32>
    %30 = arith.subf %29, %21 : vector<4x32xf32>
    %31 = arith.mulf %30, %28 : vector<4x32xf32>
    %32 = arith.mulf %21, %2 : vector<4x32xf32>
    %33 = arith.addf %31, %32 : vector<4x32xf32>
    %c1 = arith.constant 1 : index
    %c0_10 = arith.constant 0 : index
    %c0_11 = arith.constant 0 : index
    %34 = vector.load %arg1[%c1, %c0_10, %c0_11] : memref<8x4x96xf32, #tpu.memory_space<vmem>>, vector<1x4x96xf32>
    %35 = vector.shape_cast %34 : vector<1x4x96xf32> to vector<4x96xf32>
    %cst_12 = arith.constant dense<0.000000e+00> : vector<4x96xf32>
    %36 = tpu.matmul %33, %0, %cst_12 {dimension_numbers = #tpu.dot_dimension_numbers<[1], [0], [0], [1], [0, 0, 1, 1], [], []>} : vector<4x32xf32>, vector<32x96xf32>, vector<4x96xf32> -> vector<4x96xf32>
    %37 = vector.extract_strided_slice %35 {offsets = [0, 0], sizes = [4, 32], strides = [1, 1]} : vector<4x96xf32> to vector<4x32xf32>
    %38 = vector.extract_strided_slice %36 {offsets = [0, 0], sizes = [4, 32], strides = [1, 1]} : vector<4x96xf32> to vector<4x32xf32>
    %39 = arith.addf %37, %38 : vector<4x32xf32>
    %40 = arith.negf %39 : vector<4x32xf32>
    %41 = math.exp %40 : vector<4x32xf32>
    %cst_13 = arith.constant 1.000000e+00 : f32
    %42 = vector.broadcast %cst_13 : f32 to vector<4x32xf32>
    %43 = arith.addf %42, %41 : vector<4x32xf32>
    %44 = arith.divf %42, %43 : vector<4x32xf32>
    %45 = vector.extract_strided_slice %35 {offsets = [0, 32], sizes = [4, 32], strides = [1, 1]} : vector<4x96xf32> to vector<4x32xf32>
    %46 = vector.extract_strided_slice %36 {offsets = [0, 32], sizes = [4, 32], strides = [1, 1]} : vector<4x96xf32> to vector<4x32xf32>
    %47 = arith.addf %45, %46 : vector<4x32xf32>
    %48 = arith.negf %47 : vector<4x32xf32>
    %49 = math.exp %48 : vector<4x32xf32>
    %cst_14 = arith.constant 1.000000e+00 : f32
    %50 = vector.broadcast %cst_14 : f32 to vector<4x32xf32>
    %51 = arith.addf %50, %49 : vector<4x32xf32>
    %52 = arith.divf %50, %51 : vector<4x32xf32>
    %53 = vector.extract_strided_slice %35 {offsets = [0, 64], sizes = [4, 32], strides = [1, 1]} : vector<4x96xf32> to vector<4x32xf32>
    %54 = vector.extract_strided_slice %36 {offsets = [0, 64], sizes = [4, 32], strides = [1, 1]} : vector<4x96xf32> to vector<4x32xf32>
    %55 = vector.broadcast %1 : vector<1x32xf32> to vector<4x32xf32>
    %56 = arith.addf %54, %55 : vector<4x32xf32>
    %57 = arith.mulf %44, %56 : vector<4x32xf32>
    %58 = arith.addf %53, %57 : vector<4x32xf32>
    %59 = math.tanh %58 : vector<4x32xf32>
    %cst_15 = arith.constant 1.000000e+00 : f32
    %60 = vector.broadcast %cst_15 : f32 to vector<4x32xf32>
    %61 = arith.subf %60, %52 : vector<4x32xf32>
    %62 = arith.mulf %61, %59 : vector<4x32xf32>
    %63 = arith.mulf %52, %33 : vector<4x32xf32>
    %64 = arith.addf %62, %63 : vector<4x32xf32>
    %c2 = arith.constant 2 : index
    %c0_16 = arith.constant 0 : index
    %c0_17 = arith.constant 0 : index
    %65 = vector.load %arg1[%c2, %c0_16, %c0_17] : memref<8x4x96xf32, #tpu.memory_space<vmem>>, vector<1x4x96xf32>
    %66 = vector.shape_cast %65 : vector<1x4x96xf32> to vector<4x96xf32>
    %cst_18 = arith.constant dense<0.000000e+00> : vector<4x96xf32>
    %67 = tpu.matmul %64, %0, %cst_18 {dimension_numbers = #tpu.dot_dimension_numbers<[1], [0], [0], [1], [0, 0, 1, 1], [], []>} : vector<4x32xf32>, vector<32x96xf32>, vector<4x96xf32> -> vector<4x96xf32>
    %68 = vector.extract_strided_slice %66 {offsets = [0, 0], sizes = [4, 32], strides = [1, 1]} : vector<4x96xf32> to vector<4x32xf32>
    %69 = vector.extract_strided_slice %67 {offsets = [0, 0], sizes = [4, 32], strides = [1, 1]} : vector<4x96xf32> to vector<4x32xf32>
    %70 = arith.addf %68, %69 : vector<4x32xf32>
    %71 = arith.negf %70 : vector<4x32xf32>
    %72 = math.exp %71 : vector<4x32xf32>
    %cst_19 = arith.constant 1.000000e+00 : f32
    %73 = vector.broadcast %cst_19 : f32 to vector<4x32xf32>
    %74 = arith.addf %73, %72 : vector<4x32xf32>
    %75 = arith.divf %73, %74 : vector<4x32xf32>
    %76 = vector.extract_strided_slice %66 {offsets = [0, 32], sizes = [4, 32], strides = [1, 1]} : vector<4x96xf32> to vector<4x32xf32>
    %77 = vector.extract_strided_slice %67 {offsets = [0, 32], sizes = [4, 32], strides = [1, 1]} : vector<4x96xf32> to vector<4x32xf32>
    %78 = arith.addf %76, %77 : vector<4x32xf32>
    %79 = arith.negf %78 : vector<4x32xf32>
    %80 = math.exp %79 : vector<4x32xf32>
    %cst_20 = arith.constant 1.000000e+00 : f32
    %81 = vector.broadcast %cst_20 : f32 to vector<4x32xf32>
    %82 = arith.addf %81, %80 : vector<4x32xf32>
    %83 = arith.divf %81, %82 : vector<4x32xf32>
    %84 = vector.extract_strided_slice %66 {offsets = [0, 64], sizes = [4, 32], strides = [1, 1]} : vector<4x96xf32> to vector<4x32xf32>
    %85 = vector.extract_strided_slice %67 {offsets = [0, 64], sizes = [4, 32], strides = [1, 1]} : vector<4x96xf32> to vector<4x32xf32>
    %86 = vector.broadcast %1 : vector<1x32xf32> to vector<4x32xf32>
    %87 = arith.addf %85, %86 : vector<4x32xf32>
    %88 = arith.mulf %75, %87 : vector<4x32xf32>
    %89 = arith.addf %84, %88 : vector<4x32xf32>
    %90 = math.tanh %89 : vector<4x32xf32>
    %cst_21 = arith.constant 1.000000e+00 : f32
    %91 = vector.broadcast %cst_21 : f32 to vector<4x32xf32>
    %92 = arith.subf %91, %83 : vector<4x32xf32>
    %93 = arith.mulf %92, %90 : vector<4x32xf32>
    %94 = arith.mulf %83, %64 : vector<4x32xf32>
    %95 = arith.addf %93, %94 : vector<4x32xf32>
    %c3 = arith.constant 3 : index
    %c0_22 = arith.constant 0 : index
    %c0_23 = arith.constant 0 : index
    %96 = vector.load %arg1[%c3, %c0_22, %c0_23] : memref<8x4x96xf32, #tpu.memory_space<vmem>>, vector<1x4x96xf32>
    %97 = vector.shape_cast %96 : vector<1x4x96xf32> to vector<4x96xf32>
    %cst_24 = arith.constant dense<0.000000e+00> : vector<4x96xf32>
    %98 = tpu.matmul %95, %0, %cst_24 {dimension_numbers = #tpu.dot_dimension_numbers<[1], [0], [0], [1], [0, 0, 1, 1], [], []>} : vector<4x32xf32>, vector<32x96xf32>, vector<4x96xf32> -> vector<4x96xf32>
    %99 = vector.extract_strided_slice %97 {offsets = [0, 0], sizes = [4, 32], strides = [1, 1]} : vector<4x96xf32> to vector<4x32xf32>
    %100 = vector.extract_strided_slice %98 {offsets = [0, 0], sizes = [4, 32], strides = [1, 1]} : vector<4x96xf32> to vector<4x32xf32>
    %101 = arith.addf %99, %100 : vector<4x32xf32>
    %102 = arith.negf %101 : vector<4x32xf32>
    %103 = math.exp %102 : vector<4x32xf32>
    %cst_25 = arith.constant 1.000000e+00 : f32
    %104 = vector.broadcast %cst_25 : f32 to vector<4x32xf32>
    %105 = arith.addf %104, %103 : vector<4x32xf32>
    %106 = arith.divf %104, %105 : vector<4x32xf32>
    %107 = vector.extract_strided_slice %97 {offsets = [0, 32], sizes = [4, 32], strides = [1, 1]} : vector<4x96xf32> to vector<4x32xf32>
    %108 = vector.extract_strided_slice %98 {offsets = [0, 32], sizes = [4, 32], strides = [1, 1]} : vector<4x96xf32> to vector<4x32xf32>
    %109 = arith.addf %107, %108 : vector<4x32xf32>
    %110 = arith.negf %109 : vector<4x32xf32>
    %111 = math.exp %110 : vector<4x32xf32>
    %cst_26 = arith.constant 1.000000e+00 : f32
    %112 = vector.broadcast %cst_26 : f32 to vector<4x32xf32>
    %113 = arith.addf %112, %111 : vector<4x32xf32>
    %114 = arith.divf %112, %113 : vector<4x32xf32>
    %115 = vector.extract_strided_slice %97 {offsets = [0, 64], sizes = [4, 32], strides = [1, 1]} : vector<4x96xf32> to vector<4x32xf32>
    %116 = vector.extract_strided_slice %98 {offsets = [0, 64], sizes = [4, 32], strides = [1, 1]} : vector<4x96xf32> to vector<4x32xf32>
    %117 = vector.broadcast %1 : vector<1x32xf32> to vector<4x32xf32>
    %118 = arith.addf %116, %117 : vector<4x32xf32>
    %119 = arith.mulf %106, %118 : vector<4x32xf32>
    %120 = arith.addf %115, %119 : vector<4x32xf32>
    %121 = math.tanh %120 : vector<4x32xf32>
    %cst_27 = arith.constant 1.000000e+00 : f32
    %122 = vector.broadcast %cst_27 : f32 to vector<4x32xf32>
    %123 = arith.subf %122, %114 : vector<4x32xf32>
    %124 = arith.mulf %123, %121 : vector<4x32xf32>
    %125 = arith.mulf %114, %95 : vector<4x32xf32>
    %126 = arith.addf %124, %125 : vector<4x32xf32>
    %c4 = arith.constant 4 : index
    %c0_28 = arith.constant 0 : index
    %c0_29 = arith.constant 0 : index
    %127 = vector.load %arg1[%c4, %c0_28, %c0_29] : memref<8x4x96xf32, #tpu.memory_space<vmem>>, vector<1x4x96xf32>
    %128 = vector.shape_cast %127 : vector<1x4x96xf32> to vector<4x96xf32>
    %cst_30 = arith.constant dense<0.000000e+00> : vector<4x96xf32>
    %129 = tpu.matmul %126, %0, %cst_30 {dimension_numbers = #tpu.dot_dimension_numbers<[1], [0], [0], [1], [0, 0, 1, 1], [], []>} : vector<4x32xf32>, vector<32x96xf32>, vector<4x96xf32> -> vector<4x96xf32>
    %130 = vector.extract_strided_slice %128 {offsets = [0, 0], sizes = [4, 32], strides = [1, 1]} : vector<4x96xf32> to vector<4x32xf32>
    %131 = vector.extract_strided_slice %129 {offsets = [0, 0], sizes = [4, 32], strides = [1, 1]} : vector<4x96xf32> to vector<4x32xf32>
    %132 = arith.addf %130, %131 : vector<4x32xf32>
    %133 = arith.negf %132 : vector<4x32xf32>
    %134 = math.exp %133 : vector<4x32xf32>
    %cst_31 = arith.constant 1.000000e+00 : f32
    %135 = vector.broadcast %cst_31 : f32 to vector<4x32xf32>
    %136 = arith.addf %135, %134 : vector<4x32xf32>
    %137 = arith.divf %135, %136 : vector<4x32xf32>
    %138 = vector.extract_strided_slice %128 {offsets = [0, 32], sizes = [4, 32], strides = [1, 1]} : vector<4x96xf32> to vector<4x32xf32>
    %139 = vector.extract_strided_slice %129 {offsets = [0, 32], sizes = [4, 32], strides = [1, 1]} : vector<4x96xf32> to vector<4x32xf32>
    %140 = arith.addf %138, %139 : vector<4x32xf32>
    %141 = arith.negf %140 : vector<4x32xf32>
    %142 = math.exp %141 : vector<4x32xf32>
    %cst_32 = arith.constant 1.000000e+00 : f32
    %143 = vector.broadcast %cst_32 : f32 to vector<4x32xf32>
    %144 = arith.addf %143, %142 : vector<4x32xf32>
    %145 = arith.divf %143, %144 : vector<4x32xf32>
    %146 = vector.extract_strided_slice %128 {offsets = [0, 64], sizes = [4, 32], strides = [1, 1]} : vector<4x96xf32> to vector<4x32xf32>
    %147 = vector.extract_strided_slice %129 {offsets = [0, 64], sizes = [4, 32], strides = [1, 1]} : vector<4x96xf32> to vector<4x32xf32>
    %148 = vector.broadcast %1 : vector<1x32xf32> to vector<4x32xf32>
    %149 = arith.addf %147, %148 : vector<4x32xf32>
    %150 = arith.mulf %137, %149 : vector<4x32xf32>
    %151 = arith.addf %146, %150 : vector<4x32xf32>
    %152 = math.tanh %151 : vector<4x32xf32>
    %cst_33 = arith.constant 1.000000e+00 : f32
    %153 = vector.broadcast %cst_33 : f32 to vector<4x32xf32>
    %154 = arith.subf %153, %145 : vector<4x32xf32>
    %155 = arith.mulf %154, %152 : vector<4x32xf32>
    %156 = arith.mulf %145, %126 : vector<4x32xf32>
    %157 = arith.addf %155, %156 : vector<4x32xf32>
    %c5 = arith.constant 5 : index
    %c0_34 = arith.constant 0 : index
    %c0_35 = arith.constant 0 : index
    %158 = vector.load %arg1[%c5, %c0_34, %c0_35] : memref<8x4x96xf32, #tpu.memory_space<vmem>>, vector<1x4x96xf32>
    %159 = vector.shape_cast %158 : vector<1x4x96xf32> to vector<4x96xf32>
    %cst_36 = arith.constant dense<0.000000e+00> : vector<4x96xf32>
    %160 = tpu.matmul %157, %0, %cst_36 {dimension_numbers = #tpu.dot_dimension_numbers<[1], [0], [0], [1], [0, 0, 1, 1], [], []>} : vector<4x32xf32>, vector<32x96xf32>, vector<4x96xf32> -> vector<4x96xf32>
    %161 = vector.extract_strided_slice %159 {offsets = [0, 0], sizes = [4, 32], strides = [1, 1]} : vector<4x96xf32> to vector<4x32xf32>
    %162 = vector.extract_strided_slice %160 {offsets = [0, 0], sizes = [4, 32], strides = [1, 1]} : vector<4x96xf32> to vector<4x32xf32>
    %163 = arith.addf %161, %162 : vector<4x32xf32>
    %164 = arith.negf %163 : vector<4x32xf32>
    %165 = math.exp %164 : vector<4x32xf32>
    %cst_37 = arith.constant 1.000000e+00 : f32
    %166 = vector.broadcast %cst_37 : f32 to vector<4x32xf32>
    %167 = arith.addf %166, %165 : vector<4x32xf32>
    %168 = arith.divf %166, %167 : vector<4x32xf32>
    %169 = vector.extract_strided_slice %159 {offsets = [0, 32], sizes = [4, 32], strides = [1, 1]} : vector<4x96xf32> to vector<4x32xf32>
    %170 = vector.extract_strided_slice %160 {offsets = [0, 32], sizes = [4, 32], strides = [1, 1]} : vector<4x96xf32> to vector<4x32xf32>
    %171 = arith.addf %169, %170 : vector<4x32xf32>
    %172 = arith.negf %171 : vector<4x32xf32>
    %173 = math.exp %172 : vector<4x32xf32>
    %cst_38 = arith.constant 1.000000e+00 : f32
    %174 = vector.broadcast %cst_38 : f32 to vector<4x32xf32>
    %175 = arith.addf %174, %173 : vector<4x32xf32>
    %176 = arith.divf %174, %175 : vector<4x32xf32>
    %177 = vector.extract_strided_slice %159 {offsets = [0, 64], sizes = [4, 32], strides = [1, 1]} : vector<4x96xf32> to vector<4x32xf32>
    %178 = vector.extract_strided_slice %160 {offsets = [0, 64], sizes = [4, 32], strides = [1, 1]} : vector<4x96xf32> to vector<4x32xf32>
    %179 = vector.broadcast %1 : vector<1x32xf32> to vector<4x32xf32>
    %180 = arith.addf %178, %179 : vector<4x32xf32>
    %181 = arith.mulf %168, %180 : vector<4x32xf32>
    %182 = arith.addf %177, %181 : vector<4x32xf32>
    %183 = math.tanh %182 : vector<4x32xf32>
    %cst_39 = arith.constant 1.000000e+00 : f32
    %184 = vector.broadcast %cst_39 : f32 to vector<4x32xf32>
    %185 = arith.subf %184, %176 : vector<4x32xf32>
    %186 = arith.mulf %185, %183 : vector<4x32xf32>
    %187 = arith.mulf %176, %157 : vector<4x32xf32>
    %188 = arith.addf %186, %187 : vector<4x32xf32>
    %c6 = arith.constant 6 : index
    %c0_40 = arith.constant 0 : index
    %c0_41 = arith.constant 0 : index
    %189 = vector.load %arg1[%c6, %c0_40, %c0_41] : memref<8x4x96xf32, #tpu.memory_space<vmem>>, vector<1x4x96xf32>
    %190 = vector.shape_cast %189 : vector<1x4x96xf32> to vector<4x96xf32>
    %cst_42 = arith.constant dense<0.000000e+00> : vector<4x96xf32>
    %191 = tpu.matmul %188, %0, %cst_42 {dimension_numbers = #tpu.dot_dimension_numbers<[1], [0], [0], [1], [0, 0, 1, 1], [], []>} : vector<4x32xf32>, vector<32x96xf32>, vector<4x96xf32> -> vector<4x96xf32>
    %192 = vector.extract_strided_slice %190 {offsets = [0, 0], sizes = [4, 32], strides = [1, 1]} : vector<4x96xf32> to vector<4x32xf32>
    %193 = vector.extract_strided_slice %191 {offsets = [0, 0], sizes = [4, 32], strides = [1, 1]} : vector<4x96xf32> to vector<4x32xf32>
    %194 = arith.addf %192, %193 : vector<4x32xf32>
    %195 = arith.negf %194 : vector<4x32xf32>
    %196 = math.exp %195 : vector<4x32xf32>
    %cst_43 = arith.constant 1.000000e+00 : f32
    %197 = vector.broadcast %cst_43 : f32 to vector<4x32xf32>
    %198 = arith.addf %197, %196 : vector<4x32xf32>
    %199 = arith.divf %197, %198 : vector<4x32xf32>
    %200 = vector.extract_strided_slice %190 {offsets = [0, 32], sizes = [4, 32], strides = [1, 1]} : vector<4x96xf32> to vector<4x32xf32>
    %201 = vector.extract_strided_slice %191 {offsets = [0, 32], sizes = [4, 32], strides = [1, 1]} : vector<4x96xf32> to vector<4x32xf32>
    %202 = arith.addf %200, %201 : vector<4x32xf32>
    %203 = arith.negf %202 : vector<4x32xf32>
    %204 = math.exp %203 : vector<4x32xf32>
    %cst_44 = arith.constant 1.000000e+00 : f32
    %205 = vector.broadcast %cst_44 : f32 to vector<4x32xf32>
    %206 = arith.addf %205, %204 : vector<4x32xf32>
    %207 = arith.divf %205, %206 : vector<4x32xf32>
    %208 = vector.extract_strided_slice %190 {offsets = [0, 64], sizes = [4, 32], strides = [1, 1]} : vector<4x96xf32> to vector<4x32xf32>
    %209 = vector.extract_strided_slice %191 {offsets = [0, 64], sizes = [4, 32], strides = [1, 1]} : vector<4x96xf32> to vector<4x32xf32>
    %210 = vector.broadcast %1 : vector<1x32xf32> to vector<4x32xf32>
    %211 = arith.addf %209, %210 : vector<4x32xf32>
    %212 = arith.mulf %199, %211 : vector<4x32xf32>
    %213 = arith.addf %208, %212 : vector<4x32xf32>
    %214 = math.tanh %213 : vector<4x32xf32>
    %cst_45 = arith.constant 1.000000e+00 : f32
    %215 = vector.broadcast %cst_45 : f32 to vector<4x32xf32>
    %216 = arith.subf %215, %207 : vector<4x32xf32>
    %217 = arith.mulf %216, %214 : vector<4x32xf32>
    %218 = arith.mulf %207, %188 : vector<4x32xf32>
    %219 = arith.addf %217, %218 : vector<4x32xf32>
    %c7 = arith.constant 7 : index
    %c0_46 = arith.constant 0 : index
    %c0_47 = arith.constant 0 : index
    %220 = vector.load %arg1[%c7, %c0_46, %c0_47] : memref<8x4x96xf32, #tpu.memory_space<vmem>>, vector<1x4x96xf32>
    %221 = vector.shape_cast %220 : vector<1x4x96xf32> to vector<4x96xf32>
    %cst_48 = arith.constant dense<0.000000e+00> : vector<4x96xf32>
    %222 = tpu.matmul %219, %0, %cst_48 {dimension_numbers = #tpu.dot_dimension_numbers<[1], [0], [0], [1], [0, 0, 1, 1], [], []>} : vector<4x32xf32>, vector<32x96xf32>, vector<4x96xf32> -> vector<4x96xf32>
    %223 = vector.extract_strided_slice %221 {offsets = [0, 0], sizes = [4, 32], strides = [1, 1]} : vector<4x96xf32> to vector<4x32xf32>
    %224 = vector.extract_strided_slice %222 {offsets = [0, 0], sizes = [4, 32], strides = [1, 1]} : vector<4x96xf32> to vector<4x32xf32>
    %225 = arith.addf %223, %224 : vector<4x32xf32>
    %226 = arith.negf %225 : vector<4x32xf32>
    %227 = math.exp %226 : vector<4x32xf32>
    %cst_49 = arith.constant 1.000000e+00 : f32
    %228 = vector.broadcast %cst_49 : f32 to vector<4x32xf32>
    %229 = arith.addf %228, %227 : vector<4x32xf32>
    %230 = arith.divf %228, %229 : vector<4x32xf32>
    %231 = vector.extract_strided_slice %221 {offsets = [0, 32], sizes = [4, 32], strides = [1, 1]} : vector<4x96xf32> to vector<4x32xf32>
    %232 = vector.extract_strided_slice %222 {offsets = [0, 32], sizes = [4, 32], strides = [1, 1]} : vector<4x96xf32> to vector<4x32xf32>
    %233 = arith.addf %231, %232 : vector<4x32xf32>
    %234 = arith.negf %233 : vector<4x32xf32>
    %235 = math.exp %234 : vector<4x32xf32>
    %cst_50 = arith.constant 1.000000e+00 : f32
    %236 = vector.broadcast %cst_50 : f32 to vector<4x32xf32>
    %237 = arith.addf %236, %235 : vector<4x32xf32>
    %238 = arith.divf %236, %237 : vector<4x32xf32>
    %239 = vector.extract_strided_slice %221 {offsets = [0, 64], sizes = [4, 32], strides = [1, 1]} : vector<4x96xf32> to vector<4x32xf32>
    %240 = vector.extract_strided_slice %222 {offsets = [0, 64], sizes = [4, 32], strides = [1, 1]} : vector<4x96xf32> to vector<4x32xf32>
    %241 = vector.broadcast %1 : vector<1x32xf32> to vector<4x32xf32>
    %242 = arith.addf %240, %241 : vector<4x32xf32>
    %243 = arith.mulf %230, %242 : vector<4x32xf32>
    %244 = arith.addf %239, %243 : vector<4x32xf32>
    %245 = math.tanh %244 : vector<4x32xf32>
    %cst_51 = arith.constant 1.000000e+00 : f32
    %246 = vector.broadcast %cst_51 : f32 to vector<4x32xf32>
    %247 = arith.subf %246, %238 : vector<4x32xf32>
    %248 = arith.mulf %247, %245 : vector<4x32xf32>
    %249 = arith.mulf %238, %219 : vector<4x32xf32>
    %250 = arith.addf %248, %249 : vector<4x32xf32>
    %c0_52 = arith.constant 0 : index
    %c0_53 = arith.constant 0 : index
    %251 = vector.load %arg4[%c0_52, %c0_53] : memref<4x32xf32, #tpu.memory_space<vmem>>, vector<4x32xf32>
    tpu.vector_store %arg4[%c0_52, %c0_53], %250 {strides = array<i32>} : memref<4x32xf32, #tpu.memory_space<vmem>>, vector<4x32xf32>,
    return
  }
  func.func @transform_0(%arg0: i32) -> (i32, i32, i32) {
    %c0_i32 = arith.constant 0 : i32
    %c0_i32_0 = arith.constant 0 : i32
    %c0_i32_1 = arith.constant 0 : i32
    %c0_i32_2 = arith.constant 0 : i32
    return %c0_i32, %c0_i32_0, %c0_i32_1 : i32, i32, i32
  }
  func.func @transform_1(%arg0: i32) -> (i32, i32) {
    %c0_i32 = arith.constant 0 : i32
    %c0_i32_0 = arith.constant 0 : i32
    %c0_i32_1 = arith.constant 0 : i32
    return %c0_i32, %c0_i32_0 : i32, i32
  }
  func.func @transform_2(%arg0: i32) -> (i32, i32) {
    %c0_i32 = arith.constant 0 : i32
    %c0_i32_0 = arith.constant 0 : i32
    %c0_i32_1 = arith.constant 0 : i32
    return %c0_i32, %c0_i32_0 : i32, i32
  }
  func.func @transform_3(%arg0: i32) -> (i32, i32) {
    %c0_i32 = arith.constant 0 : i32
    %c0_i32_0 = arith.constant 0 : i32
    %c0_i32_1 = arith.constant 0 : i32
    return %c0_i32, %c0_i32_0 : i32, i32
  }
}

</mosaic_0001>

<bundles_post_ra>
// kernel: tpu_custom_call.1
= control target key start
LH: loop header
LB: loop body
LE: loop exit
PB: predicated region body
PF: predicated region fallthrough
CT: control target
= control target key end

     0   :  { %8 = vsyncpa [#allocation3], 0  ;;  %s859_s0 = inlined_call_operand.hbm [shape: f32[8,4,96], index: 0, kind: input, shape index: {}]   ;;  %s860_s1 = inlined_call_operand.hbm [shape: f32[32,96], index: 1, kind: input, shape index: {}]   ;;  %s861_s2 = inlined_call_operand.vmem [shape: f32[1,32], index: 2, kind: input, shape index: {}]   ;;  %s862_s3 = inlined_call_operand.hbm [shape: f32[4,32], index: 3, kind: output, shape index: {}]  }
   0x1   :  { %9 = vsyncpa [#allocation6], 0 }
   0x2   :  { %10 = vsyncpa [#allocation4], 0  ;;  %s15_s14 = sshll.u32 %s859_s0, 4  ;;  %s766_s15 = smov [#allocation2]   ;;  %s16_s14 = int_to_ptr.hbm [resolvable:$true] %s15_s14 }
   0x3   :  { %s17_s16 = sshll.u32 %s766_s15, 4  ;;  %s28_s19 = sshll.u32 %s860_s1, 4  ;;  %s18_s16 = int_to_ptr.vmem [resolvable:$true] %s17_s16  ;;  %s29_s19 = int_to_ptr.hbm [resolvable:$true] %s28_s19 }
   0x4   :  { %s767_s20 = smov 64   ;;  %s768_s21 = smov 4  }
   0x5   :  { %23 = dma.hbm_to_vmem [thread:$0]  %s16_s14, 512, %s18_s16, [#allocation3], %s767_s20, %s767_s20, %s768_s21  }
   0x6   :  { %s769_s22 = smov [#allocation5]   ;;  %s770_s24 = smov 128  }
   0x7   :  { %s30_s23 = sshll.u32 %s769_s22, 4  ;;  %s771_s25 = smov 8   ;;  %s31_s23 = int_to_ptr.vmem [resolvable:$true] %s30_s23 }
   0x8   :  { %36 = dma.hbm_to_vmem [thread:$0]  %s29_s19, 512, %s31_s23, [#allocation6], %s770_s24, %s770_s24, %s771_s25  }
   0x9   :  { %760 = dma.done.wait [#allocation3], 512  }
   0xa   :  { %761 = vsyncadd [#allocation3], 4294966784 }
   0xb   :  { %762 = dma.done.wait [#allocation6], 512  }
   0xc   :  { %763 = vsyncadd [#allocation6], 4294966784  ;;  %v50_v0 = vld [vmem:[#allocation5 + $0x18] sm:$0xff]  ;;  %v49_v1 = vld [vmem:[#allocation5 + $0x10] sm:$0xff]  ;;  %v772_v5 = vmov 0.0   ;;  %vm53_vm4 = vcmask 261120  }
   0xd   :  { %69 = vmatpush.msra.mxu0 %v50_v0  ;;  %v639_v2 = vld [vmem:[%s861_s2] ss:$0 sm:$0xff]  ;;  %141 = vmatpush.msra.mxu1 %v50_v0  ;;  %v48_v3 = vld [vmem:[#allocation5 + $0x8] sm:$0xff]  ;;  %s773_s2 = smov 96   ;;  %v123_v37 = vld [vmem:[#allocation2 + $0x4] sm:$0xf] }
   0xe   :  { %208 = vmatpush.msra.mxu2 %v50_v0  ;;  %275 = vmatpush.msra.mxu3 %v50_v0  ;;  %v47_v4 = vld [vmem:[#allocation5] sm:$0xff]  ;;  %s774_s26 = smov [#allocation7]   ;;  %s604_s30 = sshll.u32 %s862_s3, 4  ;;  %s605_s30 = int_to_ptr.hbm [resolvable:$true] %s604_s30 }
   0xf   :  { %70 = vmatpush.msra.mxu0 %v49_v1  ;;  %99 = vrot.lane.b32.xlu0 %v639_v2, %s767_s20  ;;  %v52_v9 = vld [vmem:[#allocation2] sm:$0xf]  ;;  %s602_s27 = sshll.u32 %s774_s26, 4  ;;  %s603_s27 = int_to_ptr.vmem [resolvable:$true] %s602_s27 }
  0x10   :  { %142 = vmatpush.msra.mxu1 %v49_v1  ;;  %209 = vmatpush.msra.mxu2 %v49_v1 }
  0x11   :  { %71 = vmatpush.msra.mxu0 %v48_v3  ;;  %276 = vmatpush.msra.mxu3 %v49_v1 }
  0x12   :  { %143 = vmatpush.msra.mxu1 %v48_v3  ;;  %210 = vmatpush.msra.mxu2 %v48_v3 }
  0x13   :  { %72 = vmatpush.msra.mxu0 %v47_v4  ;;  %277 = vmatpush.msra.mxu3 %v48_v3 }
  0x14   :  { %73 = vmatmul.f32.vlgmr.msra.gmra.mxu0 %v772_v5  ;;  %144 = vmatpush.msra.mxu1 %v47_v4 }
  0x15   :  { %211 = vmatpush.msra.mxu2 %v47_v4  ;;  %278 = vmatpush.msra.mxu3 %v47_v4 }
  0x16   :  { %342 = vmatpush.msrb.mxu0 %v50_v0  ;;  %409 = vmatpush.msrb.mxu1 %v50_v0 }
  0x17   :  { %476 = vmatpush.msrb.mxu2 %v50_v0  ;;  %543 = vmatpush.msrb.mxu3 %v50_v0 }
  0x18   :  { %343 = vmatpush.msrb.mxu0 %v49_v1  ;;  %410 = vmatpush.msrb.mxu1 %v49_v1 }
  0x19   :  { %477 = vmatpush.msrb.mxu2 %v49_v1  ;;  %544 = vmatpush.msrb.mxu3 %v49_v1  ;;  %v190_v1 = vld [vmem:[#allocation2 + $0x8] sm:$0xf] }
  0x1a   :  { %344 = vmatpush.msrb.mxu0 %v48_v3  ;;  %411 = vmatpush.msrb.mxu1 %v48_v3 }
  0x1b   :  { %478 = vmatpush.msrb.mxu2 %v48_v3  ;;  %545 = vmatpush.msrb.mxu3 %v48_v3 }
  0x1c   :  { %345 = vmatpush.msrb.mxu0 %v47_v4  ;;  %412 = vmatpush.msrb.mxu1 %v47_v4 }
  0x1d   :  { %479 = vmatpush.msrb.mxu2 %v47_v4  ;;  %546 = vmatpush.msrb.mxu3 %v47_v4 }
  0x81   :  { %v807_v6 = vpop.permute.xlu0 %99 }
  0x91   :  { %v74_v7 = vpop.f32.mrf.mxu0 }
  0x92   :  { %v102_v8 = vadd.f32 %v807_v6, %v74_v7  ;;  %v77_v10 = vadd.f32 %v74_v7, %v52_v9 }
  0x94   :  { %104 = vrot.lane.b32.xlu0 %v102_v8, %s767_s20  ;;  %v615_v11 = vmul.f32 -1.442695, %v77_v10 }
  0x96   :  { %640 = vpow2.f32 %v615_v11 }
  0x9c   :  { %v641_v12 = vpop.eup %640 }
  0x9d   :  { %v81_v13 = vadd.f32 1.0, %v641_v12 }
  0x9f   :  { %642 = vrcp.f32 %v81_v13  ;;  %v93_v19 = vand.u32 2147483648, %v81_v13  ;;  %vm87_vm1 = vweird.f32 %v81_v13  ;;  %v91_v20 = vand.u32 2147483647, %v81_v13 }
  0xa1   :  { %v94_v22 = vor.u32 1.1754944e-38, %v93_v19  ;;  %vm92_vm3 = vcmp.eq.f32.partialorder %v91_v20, 8.507059e+37 }
  0xa5   :  { %v643_v14 = vpop.eup %642 }
  0xa6   :  { %v83_v15 = vmul.f32 %v643_v14, %v81_v13  ;;  %vm88_vm0 = vweird.f32 %v643_v14 }
  0xa7   :  { %vm89_vm2 = vmor %vm87_vm1, %vm88_vm0 }
  0xa8   :  { %v84_v16 = vsub.f32 1.0, %v83_v15 }
  0xaa   :  { %v85_v17 = vmul.f32 %v643_v14, %v84_v16 }
  0xac   :  { %v86_v18 = vadd.f32 %v643_v14, %v85_v17 }
  0xae   :  { %v90_v21 = vsel %vm89_vm2, %v643_v14, %v86_v18 }
  0xaf   :  { %v95_v24 = vsel %vm92_vm3, %v94_v22, %v90_v21 }
  0xb0   :  { %v114_v29 = vsub.f32 1.0, %v95_v24  ;;  %v120_v32 = vmul.f32 0.0, %v95_v24 }
 0x106   :  { %v105_v23 = vpop.permute.xlu0 %104 }
 0x107   :  { %v107_v25 = vmul.f32 %v105_v23, %v95_v24 }
 0x109   :  { %109 = vrot.lane.b32.xlu1 %v107_v25, %s767_s20 }
 0x17b   :  { %v110_v26 = vpop.permute.xlu1 %109 }
 0x17c   :  { %v112_v27 = vadd.f32 %v110_v26, %v52_v9 }
 0x17e   :  { %644 = vtanh.f32 %v112_v27 }
 0x184   :  { %v645_v28 = vpop.eup %644 }
 0x185   :  { %116 = vrot.lane.b32.xlu1 %v645_v28, %s773_s2 }
 0x1f7   :  { %v117_v30 = vpop.permute.xlu1 %116 }
 0x1f8   :  { %v119_v31 = vmul.f32 %v117_v30, %v114_v29  ;;  %v257_v30 = vld [vmem:[#allocation2 + $0xc] sm:$0xf] }
 0x1fa   :  { %v121_v33 = vadd.f32 %v120_v32, %v119_v31 }
 0x1fc   :  { %125 = vrot.lane.b32.xlu2 %v121_v33, %s773_s2 }
 0x256   :  { %v126_v34 = vpop.permute.xlu2 %125 }
 0x257   :  { %616 = vmatmul.msk.f32.vlgmr.msra.gmra.mxu1 %vm53_vm4, %v126_v34 }
 0x2d4   :  { %v146_v35 = vpop.f32.mrf.mxu1 }
 0x2d5   :  { %v169_v36 = vadd.f32 %v146_v35, %v807_v6  ;;  %v149_v38 = vadd.f32 %v146_v35, %v123_v37 }
 0x2d7   :  { %171 = vrot.lane.b32.xlu2 %v169_v36, %s767_s20  ;;  %v617_v39 = vmul.f32 -1.442695, %v149_v38 }
 0x2d9   :  { %646 = vpow2.f32 %v617_v39 }
 0x2df   :  { %v647_v40 = vpop.eup %646 }
 0x2e0   :  { %v153_v41 = vadd.f32 1.0, %v647_v40 }
 0x2e2   :  { %648 = vrcp.f32 %v153_v41  ;;  %v165_v47 = vand.u32 2147483648, %v153_v41  ;;  %vm159_vm6 = vweird.f32 %v153_v41  ;;  %v163_v48 = vand.u32 2147483647, %v153_v41 }
 0x2e4   :  { %v166_v50 = vor.u32 1.1754944e-38, %v165_v47  ;;  %vm164_vm8 = vcmp.eq.f32.partialorder %v163_v48, 8.507059e+37 }
 0x2e8   :  { %v649_v42 = vpop.eup %648 }
 0x2e9   :  { %v155_v43 = vmul.f32 %v649_v42, %v153_v41  ;;  %vm160_vm5 = vweird.f32 %v649_v42 }
 0x2ea   :  { %vm161_vm7 = vmor %vm159_vm6, %vm160_vm5 }
 0x2eb   :  { %v156_v44 = vsub.f32 1.0, %v155_v43 }
 0x2ed   :  { %v157_v45 = vmul.f32 %v649_v42, %v156_v44 }
 0x2ef   :  { %v158_v46 = vadd.f32 %v649_v42, %v157_v45 }
 0x2f1   :  { %v162_v49 = vsel %vm161_vm7, %v649_v42, %v158_v46 }
 0x2f2   :  { %v167_v52 = vsel %vm164_vm8, %v166_v50, %v162_v49 }
 0x2f3   :  { %v181_v57 = vsub.f32 1.0, %v167_v52  ;;  %v187_v59 = vmul.f32 %v167_v52, %v121_v33 }
 0x331   :  { %v172_v51 = vpop.permute.xlu2 %171 }
 0x332   :  { %v174_v53 = vmul.f32 %v172_v51, %v167_v52 }
 0x334   :  { %176 = vrot.lane.b32.xlu0 %v174_v53, %s767_s20 }
 0x3a6   :  { %v177_v54 = vpop.permute.xlu0 %176 }
 0x3a7   :  { %v179_v55 = vadd.f32 %v177_v54, %v123_v37 }
 0x3a9   :  { %650 = vtanh.f32 %v179_v55 }
 0x3af   :  { %v651_v56 = vpop.eup %650 }
 0x3b0   :  { %183 = vrot.lane.b32.xlu1 %v651_v56, %s773_s2 }
 0x422   :  { %v184_v58 = vpop.permute.xlu1 %183 }
 0x423   :  { %v186_v60 = vmul.f32 %v184_v58, %v181_v57  ;;  %v324_v58 = vld [vmem:[#allocation2 + $0x10] sm:$0xf] }
 0x425   :  { %v188_v61 = vadd.f32 %v187_v59, %v186_v60 }
 0x427   :  { %192 = vrot.lane.b32.xlu2 %v188_v61, %s773_s2 }
 0x481   :  { %v193_v62 = vpop.permute.xlu2 %192 }
 0x482   :  { %618 = vmatmul.msk.f32.vlgmr.msra.gmra.mxu2 %vm53_vm4, %v193_v62 }
 0x505   :  { %v213_v63 = vpop.f32.mrf.mxu2 }
 0x506   :  { %v236_v0 = vadd.f32 %v213_v63, %v807_v6  ;;  %v216_v2 = vadd.f32 %v213_v63, %v190_v1 }
 0x508   :  { %238 = vrot.lane.b32.xlu0 %v236_v0, %s767_s20  ;;  %v619_v3 = vmul.f32 -1.442695, %v216_v2 }
 0x50a   :  { %652 = vpow2.f32 %v619_v3 }
 0x510   :  { %v653_v4 = vpop.eup %652 }
 0x511   :  { %v220_v5 = vadd.f32 1.0, %v653_v4 }
 0x513   :  { %654 = vrcp.f32 %v220_v5  ;;  %v232_v12 = vand.u32 2147483648, %v220_v5  ;;  %vm226_vm10 = vweird.f32 %v220_v5  ;;  %v230_v13 = vand.u32 2147483647, %v220_v5 }
 0x515   :  { %v233_v15 = vor.u32 1.1754944e-38, %v232_v12  ;;  %vm231_vm12 = vcmp.eq.f32.partialorder %v230_v13, 8.507059e+37 }
 0x519   :  { %v655_v7 = vpop.eup %654 }
 0x51a   :  { %v222_v8 = vmul.f32 %v655_v7, %v220_v5  ;;  %vm227_vm9 = vweird.f32 %v655_v7 }
 0x51b   :  { %vm228_vm11 = vmor %vm226_vm10, %vm227_vm9 }
 0x51c   :  { %v223_v9 = vsub.f32 1.0, %v222_v8 }
 0x51e   :  { %v224_v10 = vmul.f32 %v655_v7, %v223_v9 }
 0x520   :  { %v225_v11 = vadd.f32 %v655_v7, %v224_v10 }
 0x522   :  { %v229_v14 = vsel %vm228_vm11, %v655_v7, %v225_v11 }
 0x523   :  { %v234_v17 = vsel %vm231_vm12, %v233_v15, %v229_v14 }
 0x524   :  { %v248_v22 = vsub.f32 1.0, %v234_v17  ;;  %v254_v24 = vmul.f32 %v234_v17, %v188_v61 }
 0x57a   :  { %v239_v16 = vpop.permute.xlu0 %238 }
 0x57b   :  { %v241_v18 = vmul.f32 %v239_v16, %v234_v17 }
 0x57d   :  { %243 = vrot.lane.b32.xlu1 %v241_v18, %s767_s20 }
 0x5ef   :  { %v244_v19 = vpop.permute.xlu1 %243 }
 0x5f0   :  { %v246_v20 = vadd.f32 %v244_v19, %v190_v1 }
 0x5f2   :  { %656 = vtanh.f32 %v246_v20 }
 0x5f8   :  { %v657_v21 = vpop.eup %656 }
 0x5f9   :  { %250 = vrot.lane.b32.xlu2 %v657_v21, %s773_s2 }
 0x653   :  { %v251_v23 = vpop.permute.xlu2 %250 }
 0x654   :  { %v253_v25 = vmul.f32 %v251_v23, %v248_v22  ;;  %v391_v23 = vld [vmem:[#allocation2 + $0x14] sm:$0xf] }
 0x656   :  { %v255_v26 = vadd.f32 %v254_v24, %v253_v25 }
 0x658   :  { %259 = vrot.lane.b32.xlu0 %v255_v26, %s773_s2 }
 0x6ca   :  { %v260_v27 = vpop.permute.xlu0 %259 }
 0x6cb   :  { %620 = vmatmul.msk.f32.vlgmr.msra.gmra.mxu3 %vm53_vm4, %v260_v27 }
 0x74e   :  { %v280_v28 = vpop.f32.mrf.mxu3 }
 0x74f   :  { %v303_v29 = vadd.f32 %v280_v28, %v807_v6  ;;  %v283_v31 = vadd.f32 %v280_v28, %v257_v30 }
 0x751   :  { %305 = vrot.lane.b32.xlu1 %v303_v29, %s767_s20  ;;  %v621_v32 = vmul.f32 -1.442695, %v283_v31 }
 0x753   :  { %658 = vpow2.f32 %v621_v32 }
 0x759   :  { %v659_v33 = vpop.eup %658 }
 0x75a   :  { %v287_v34 = vadd.f32 1.0, %v659_v33 }
 0x75c   :  { %660 = vrcp.f32 %v287_v34  ;;  %v299_v40 = vand.u32 2147483648, %v287_v34  ;;  %vm293_vm14 = vweird.f32 %v287_v34  ;;  %v297_v41 = vand.u32 2147483647, %v287_v34 }
 0x75e   :  { %v300_v43 = vor.u32 1.1754944e-38, %v299_v40  ;;  %vm298_vm0 = vcmp.eq.f32.partialorder %v297_v41, 8.507059e+37 }
 0x762   :  { %v661_v35 = vpop.eup %660 }
 0x763   :  { %v289_v36 = vmul.f32 %v661_v35, %v287_v34  ;;  %vm294_vm13 = vweird.f32 %v661_v35 }
 0x764   :  { %vm295_vm15 = vmor %vm293_vm14, %vm294_vm13 }
 0x765   :  { %v290_v37 = vsub.f32 1.0, %v289_v36 }
 0x767   :  { %v291_v38 = vmul.f32 %v661_v35, %v290_v37 }
 0x769   :  { %v292_v39 = vadd.f32 %v661_v35, %v291_v38 }
 0x76b   :  { %v296_v42 = vsel %vm295_vm15, %v661_v35, %v292_v39 }
 0x76c   :  { %v301_v45 = vsel %vm298_vm0, %v300_v43, %v296_v42 }
 0x76d   :  { %v315_v50 = vsub.f32 1.0, %v301_v45  ;;  %v321_v52 = vmul.f32 %v301_v45, %v255_v26 }
 0x7c3   :  { %v306_v44 = vpop.permute.xlu1 %305 }
 0x7c4   :  { %v308_v46 = vmul.f32 %v306_v44, %v301_v45 }
 0x7c6   :  { %310 = vrot.lane.b32.xlu2 %v308_v46, %s767_s20 }
 0x820   :  { %v311_v47 = vpop.permute.xlu2 %310 }
 0x821   :  { %v313_v48 = vadd.f32 %v311_v47, %v257_v30 }
 0x823   :  { %662 = vtanh.f32 %v313_v48 }
 0x829   :  { %v663_v49 = vpop.eup %662 }
 0x82a   :  { %317 = vrot.lane.b32.xlu0 %v663_v49, %s773_s2 }
 0x89c   :  { %v318_v51 = vpop.permute.xlu0 %317 }
 0x89d   :  { %v320_v53 = vmul.f32 %v318_v51, %v315_v50  ;;  %v458_v51 = vld [vmem:[#allocation2 + $0x18] sm:$0xf] }
 0x89f   :  { %v322_v54 = vadd.f32 %v321_v52, %v320_v53 }
 0x8a1   :  { %326 = vrot.lane.b32.xlu1 %v322_v54, %s773_s2 }
 0x913   :  { %v327_v55 = vpop.permute.xlu1 %326 }
 0x914   :  { %622 = vmatmul.msk.f32.vlgmr.msrb.gmra.mxu0 %vm53_vm4, %v327_v55 }
 0x991   :  { %v347_v56 = vpop.f32.mrf.mxu0 }
 0x992   :  { %v370_v57 = vadd.f32 %v347_v56, %v807_v6  ;;  %v350_v59 = vadd.f32 %v347_v56, %v324_v58 }
 0x994   :  { %372 = vrot.lane.b32.xlu2 %v370_v57, %s767_s20  ;;  %v623_v60 = vmul.f32 -1.442695, %v350_v59 }
 0x996   :  { %664 = vpow2.f32 %v623_v60 }
 0x99c   :  { %v665_v61 = vpop.eup %664 }
 0x99d   :  { %v354_v62 = vadd.f32 1.0, %v665_v61 }
 0x99f   :  { %666 = vrcp.f32 %v354_v62  ;;  %v366_v4 = vand.u32 2147483648, %v354_v62  ;;  %vm360_vm2 = vweird.f32 %v354_v62  ;;  %v364_v5 = vand.u32 2147483647, %v354_v62 }
 0x9a1   :  { %v367_v8 = vor.u32 1.1754944e-38, %v366_v4  ;;  %vm365_vm5 = vcmp.eq.f32.partialorder %v364_v5, 8.507059e+37 }
 0x9a5   :  { %v667_v63 = vpop.eup %666 }
 0x9a6   :  { %v356_v0 = vmul.f32 %v667_v63, %v354_v62  ;;  %vm361_vm1 = vweird.f32 %v667_v63 }
 0x9a7   :  { %vm362_vm3 = vmor %vm360_vm2, %vm361_vm1  ;;  %vm595_vm1 = vcmask 257024  }
 0x9a8   :  { %v357_v1 = vsub.f32 1.0, %v356_v0 }
 0x9aa   :  { %v358_v2 = vmul.f32 %v667_v63, %v357_v1 }
 0x9ac   :  { %v359_v3 = vadd.f32 %v667_v63, %v358_v2 }
 0x9ae   :  { %v363_v7 = vsel %vm362_vm3, %v667_v63, %v359_v3 }
 0x9af   :  { %v368_v10 = vsel %vm365_vm5, %v367_v8, %v363_v7 }
 0x9b0   :  { %v382_v15 = vsub.f32 1.0, %v368_v10  ;;  %v388_v17 = vmul.f32 %v368_v10, %v322_v54 }
 0x9ee   :  { %v373_v9 = vpop.permute.xlu2 %372 }
 0x9ef   :  { %v375_v11 = vmul.f32 %v373_v9, %v368_v10 }
 0x9f1   :  { %377 = vrot.lane.b32.xlu0 %v375_v11, %s767_s20 }
 0xa63   :  { %v378_v12 = vpop.permute.xlu0 %377 }
 0xa64   :  { %v380_v13 = vadd.f32 %v378_v12, %v324_v58 }
 0xa66   :  { %668 = vtanh.f32 %v380_v13 }
 0xa6c   :  { %v669_v14 = vpop.eup %668 }
 0xa6d   :  { %384 = vrot.lane.b32.xlu1 %v669_v14, %s773_s2 }
 0xadf   :  { %v385_v16 = vpop.permute.xlu1 %384 }
 0xae0   :  { %v387_v18 = vmul.f32 %v385_v16, %v382_v15  ;;  %v525_v16 = vld [vmem:[#allocation2 + $0x1c] sm:$0xf] }
 0xae2   :  { %v389_v19 = vadd.f32 %v388_v17, %v387_v18 }
 0xae4   :  { %393 = vrot.lane.b32.xlu2 %v389_v19, %s773_s2 }
 0xb3e   :  { %v394_v20 = vpop.permute.xlu2 %393 }
 0xb3f   :  { %624 = vmatmul.msk.f32.vlgmr.msrb.gmra.mxu1 %vm53_vm4, %v394_v20 }
 0xbbc   :  { %v414_v21 = vpop.f32.mrf.mxu1 }
 0xbbd   :  { %v437_v22 = vadd.f32 %v414_v21, %v807_v6  ;;  %v417_v24 = vadd.f32 %v414_v21, %v391_v23 }
 0xbbf   :  { %439 = vrot.lane.b32.xlu0 %v437_v22, %s767_s20  ;;  %v625_v25 = vmul.f32 -1.442695, %v417_v24 }
 0xbc1   :  { %670 = vpow2.f32 %v625_v25 }
 0xbc7   :  { %v671_v26 = vpop.eup %670 }
 0xbc8   :  { %v421_v27 = vadd.f32 1.0, %v671_v26 }
 0xbca   :  { %672 = vrcp.f32 %v421_v27  ;;  %v433_v33 = vand.u32 2147483648, %v421_v27  ;;  %vm427_vm7 = vweird.f32 %v421_v27  ;;  %v431_v34 = vand.u32 2147483647, %v421_v27 }
 0xbcc   :  { %v434_v36 = vor.u32 1.1754944e-38, %v433_v33  ;;  %vm432_vm9 = vcmp.eq.f32.partialorder %v431_v34, 8.507059e+37 }
 0xbd0   :  { %v673_v28 = vpop.eup %672 }
 0xbd1   :  { %v423_v29 = vmul.f32 %v673_v28, %v421_v27  ;;  %vm428_vm6 = vweird.f32 %v673_v28 }
 0xbd2   :  { %vm429_vm8 = vmor %vm427_vm7, %vm428_vm6 }
 0xbd3   :  { %v424_v30 = vsub.f32 1.0, %v423_v29 }
 0xbd5   :  { %v425_v31 = vmul.f32 %v673_v28, %v424_v30 }
 0xbd7   :  { %v426_v32 = vadd.f32 %v673_v28, %v425_v31 }
 0xbd9   :  { %v430_v35 = vsel %vm429_vm8, %v673_v28, %v426_v32 }
 0xbda   :  { %v435_v38 = vsel %vm432_vm9, %v434_v36, %v430_v35 }
 0xbdb   :  { %v449_v43 = vsub.f32 1.0, %v435_v38  ;;  %v455_v45 = vmul.f32 %v435_v38, %v389_v19 }
 0xc31   :  { %v440_v37 = vpop.permute.xlu0 %439 }
 0xc32   :  { %v442_v39 = vmul.f32 %v440_v37, %v435_v38 }
 0xc34   :  { %444 = vrot.lane.b32.xlu1 %v442_v39, %s767_s20 }
 0xca6   :  { %v445_v40 = vpop.permute.xlu1 %444 }
 0xca7   :  { %v447_v41 = vadd.f32 %v445_v40, %v391_v23 }
 0xca9   :  { %674 = vtanh.f32 %v447_v41 }
 0xcaf   :  { %v675_v42 = vpop.eup %674 }
 0xcb0   :  { %451 = vrot.lane.b32.xlu2 %v675_v42, %s773_s2 }
 0xd0a   :  { %v452_v44 = vpop.permute.xlu2 %451 }
 0xd0b   :  { %v454_v46 = vmul.f32 %v452_v44, %v449_v43 }
 0xd0d   :  { %v456_v47 = vadd.f32 %v455_v45, %v454_v46 }
 0xd0f   :  { %460 = vrot.lane.b32.xlu0 %v456_v47, %s773_s2 }
 0xd81   :  { %v461_v48 = vpop.permute.xlu0 %460 }
 0xd82   :  { %626 = vmatmul.msk.f32.vlgmr.msrb.gmra.mxu2 %vm53_vm4, %v461_v48 }
 0xe05   :  { %v481_v49 = vpop.f32.mrf.mxu2 }
 0xe06   :  { %v504_v50 = vadd.f32 %v481_v49, %v807_v6  ;;  %v484_v52 = vadd.f32 %v481_v49, %v458_v51 }
 0xe08   :  { %506 = vrot.lane.b32.xlu1 %v504_v50, %s767_s20  ;;  %v627_v53 = vmul.f32 -1.442695, %v484_v52 }
 0xe0a   :  { %676 = vpow2.f32 %v627_v53 }
 0xe10   :  { %v677_v54 = vpop.eup %676 }
 0xe11   :  { %v488_v55 = vadd.f32 1.0, %v677_v54 }
 0xe13   :  { %678 = vrcp.f32 %v488_v55  ;;  %v500_v61 = vand.u32 2147483648, %v488_v55  ;;  %vm494_vm11 = vweird.f32 %v488_v55  ;;  %v498_v62 = vand.u32 2147483647, %v488_v55 }
 0xe15   :  { %v501_v0 = vor.u32 1.1754944e-38, %v500_v61  ;;  %vm499_vm13 = vcmp.eq.f32.partialorder %v498_v62, 8.507059e+37 }
 0xe19   :  { %v679_v56 = vpop.eup %678 }
 0xe1a   :  { %v490_v57 = vmul.f32 %v679_v56, %v488_v55  ;;  %vm495_vm10 = vweird.f32 %v679_v56 }
 0xe1b   :  { %vm496_vm12 = vmor %vm494_vm11, %vm495_vm10 }
 0xe1c   :  { %v491_v58 = vsub.f32 1.0, %v490_v57 }
 0xe1e   :  { %v492_v59 = vmul.f32 %v679_v56, %v491_v58 }
 0xe20   :  { %v493_v60 = vadd.f32 %v679_v56, %v492_v59 }
 0xe22   :  { %v497_v63 = vsel %vm496_vm12, %v679_v56, %v493_v60 }
 0xe23   :  { %v502_v2 = vsel %vm499_vm13, %v501_v0, %v497_v63 }
 0xe24   :  { %v516_v8 = vsub.f32 1.0, %v502_v2  ;;  %v522_v10 = vmul.f32 %v502_v2, %v456_v47 }
 0xe7a   :  { %v507_v1 = vpop.permute.xlu1 %506 }
 0xe7b   :  { %v509_v3 = vmul.f32 %v507_v1, %v502_v2 }
 0xe7d   :  { %511 = vrot.lane.b32.xlu2 %v509_v3, %s767_s20 }
 0xed7   :  { %v512_v4 = vpop.permute.xlu2 %511 }
 0xed8   :  { %v514_v5 = vadd.f32 %v512_v4, %v458_v51 }
 0xeda   :  { %680 = vtanh.f32 %v514_v5 }
 0xee0   :  { %v681_v7 = vpop.eup %680 }
 0xee1   :  { %518 = vrot.lane.b32.xlu0 %v681_v7, %s773_s2 }
 0xf53   :  { %v519_v9 = vpop.permute.xlu0 %518 }
 0xf54   :  { %v521_v11 = vmul.f32 %v519_v9, %v516_v8 }
 0xf56   :  { %v523_v12 = vadd.f32 %v522_v10, %v521_v11 }
 0xf58   :  { %527 = vrot.lane.b32.xlu1 %v523_v12, %s773_s2 }
 0xfca   :  { %v528_v13 = vpop.permute.xlu1 %527 }
 0xfcb   :  { %628 = vmatmul.msk.f32.vlgmr.msrb.gmra.mxu3 %vm53_vm4, %v528_v13 }
0x104e   :  { %v548_v14 = vpop.f32.mrf.mxu3 }
0x104f   :  { %v571_v15 = vadd.f32 %v548_v14, %v807_v6  ;;  %v551_v17 = vadd.f32 %v548_v14, %v525_v16 }
0x1051   :  { %573 = vrot.lane.b32.xlu2 %v571_v15, %s767_s20  ;;  %v629_v18 = vmul.f32 -1.442695, %v551_v17 }
0x1053   :  { %682 = vpow2.f32 %v629_v18 }
0x1059   :  { %v683_v19 = vpop.eup %682 }
0x105a   :  { %v555_v20 = vadd.f32 1.0, %v683_v19 }
0x105c   :  { %684 = vrcp.f32 %v555_v20  ;;  %v567_v26 = vand.u32 2147483648, %v555_v20  ;;  %vm561_vm4 = vweird.f32 %v555_v20  ;;  %v565_v27 = vand.u32 2147483647, %v555_v20 }
0x105e   :  { %v568_v28 = vor.u32 1.1754944e-38, %v567_v26  ;;  %vm566_vm0 = vcmp.eq.f32.partialorder %v565_v27, 8.507059e+37 }
0x1062   :  { %v685_v21 = vpop.eup %684 }
0x1063   :  { %v557_v22 = vmul.f32 %v685_v21, %v555_v20  ;;  %vm562_vm14 = vweird.f32 %v685_v21 }
0x1064   :  { %vm563_vm15 = vmor %vm561_vm4, %vm562_vm14 }
0x1065   :  { %v558_v23 = vsub.f32 1.0, %v557_v22 }
0x1067   :  { %v559_v24 = vmul.f32 %v685_v21, %v558_v23 }
0x1069   :  { %v560_v25 = vadd.f32 %v685_v21, %v559_v24 }
0x106b   :  { %v564_v6 = vsel %vm563_vm15, %v685_v21, %v560_v25 }
0x106c   :  { %v569_v30 = vsel %vm566_vm0, %v568_v28, %v564_v6 }
0x106d   :  { %v583_v35 = vsub.f32 1.0, %v569_v30  ;;  %v589_v37 = vmul.f32 %v569_v30, %v523_v12 }
0x10ab   :  { %v574_v29 = vpop.permute.xlu2 %573 }
0x10ac   :  { %v576_v31 = vmul.f32 %v574_v29, %v569_v30 }
0x10ae   :  { %578 = vrot.lane.b32.xlu0 %v576_v31, %s767_s20 }
0x1120   :  { %v579_v32 = vpop.permute.xlu0 %578 }
0x1121   :  { %v581_v33 = vadd.f32 %v579_v32, %v525_v16 }
0x1123   :  { %686 = vtanh.f32 %v581_v33 }
0x1129   :  { %v687_v34 = vpop.eup %686 }
0x112a   :  { %585 = vrot.lane.b32.xlu1 %v687_v34, %s773_s2 }
0x119c   :  { %v586_v36 = vpop.permute.xlu1 %585 }
0x119d   :  { %v588_v38 = vmul.f32 %v586_v36, %v583_v35 }
0x119f   :  { %v590_v39 = vadd.f32 %v589_v37, %v588_v38 }
0x11a1   :  { %592 = vrot.lane.b32.xlu2 %v590_v39, %s773_s2 }
0x11fb   :  { %v593_v40 = vpop.permute.xlu2 %592 }
0x11fc   :  { %596 = vst.msk [vmem:[#allocation7] sm:$0xf] %vm595_vm1, %v593_v40 }
0x11fd   :  { %607 = dma.vmem_to_hbm [thread:$0]  %s603_s27, 64, %s605_s30, [#allocation4]  }
0x11fe   :  { %764 = dma.done.wait [#allocation4], 64  }
0x11ff   :  { %765 = vsyncadd [#allocation4], 4294967232 }
0x1200   :  { %612 = vsyncpa [#allocation3], 1 }
0x1201   :  { %613 = vsyncpa [#allocation6], 1 }
0x1202   :  { %614 = vsyncpa [#allocation4], 1 }

</bundles_post_ra>
